<compile_context>
chip_gen: v5e
topology: v5e:2x2
jax: 0.10.0
libtpu: 0.0.40
codegen_flags: <defaults>
</compile_context>

<pallas_src>
import jax
import jax.numpy as jnp
from jax.experimental import pallas as pl
from jax.experimental.pallas import tpu as pltpu

IN_FEATURES = 28 * 28        # 784 (full last dim of x -> legal BlockSpec width)
HIDDEN = 256
OUT_FEATURES = 10
OUT_PAD = 128                # lane-dense output
NEG_BIAS = -1.0e30           # bias for padded logit columns -> exp() == 0


def _round_up(x: int, m: int) -> int:
    return ((x + m - 1) // m) * m


def _tb_max() -> int:
    """Per-generation batch-tile cap: v5e/v6e have 128 MiB VMEM, v7x 64 MiB."""
    try:
        vmem = pltpu.get_tpu_info().vmem_capacity_bytes
    except Exception:
        vmem = 64 << 20
    return 2048 if vmem >= (100 << 20) else 1024


def _choose_tile(B: int, tb_max: int):
    """Pick TB (multiple of 8) minimizing batch padding; >=2 grid steps once
    the batch is big enough so both v7x TensorCores get work."""
    B8 = _round_up(B, 8)
    n_tiles = max(1, -(-B8 // tb_max))
    if n_tiles == 1 and B8 >= 512:
        n_tiles = 2
    TB = _round_up(-(-B8 // n_tiles), 8)
    return TB, TB * n_tiles, n_tiles


def ffn_kernel(x_ref, w1_ref, b1_ref, w2_ref, b2_ref, o_ref):
    # x: (TB, 784) f32 streamed raw; w1: (784, 256) bf16; b1: (1, 256) f32;
    # w2: (256, 128) bf16; b2: (1, 128) f32; o: (TB, 128) f32
    x = x_ref[...].astype(jnp.bfloat16)          # in-kernel cast (VPU slack)
    # Linear(784->256) + ReLU, f32 accumulation on the MXU, K=784 (unpadded).
    h = jnp.dot(x, w1_ref[...], preferred_element_type=jnp.float32)
    h = jnp.maximum(h + b1_ref[...], 0.0)
    # Linear(256->10 padded to 128), f32 accumulation.
    logits = jnp.dot(h.astype(jnp.bfloat16), w2_ref[...],
                     preferred_element_type=jnp.float32) + b2_ref[...]
    # Numerically stable softmax over the last dim. Padded columns carry a
    # -1e30 bias, so exp() underflows to 0 and they drop out of the denom.
    m = jnp.max(logits, axis=-1, keepdims=True)
    e = jnp.exp(logits - m)
    denom = jnp.sum(e, axis=-1, keepdims=True)
    # approx=False preserves the 5e-4 check; denom is only (TB,1) so exact
    # reciprocal is a handful of VPU ops.
    o_ref[...] = e * pl.reciprocal(denom, approx=False)


def fedd_forward_net(x_nchw, w1, b1, w2, b2):
    """Forward pass matching feddForwardNet.

    x_nchw: (B, 1, 28, 28) float32 (PyTorch NCHW layout)
    returns: (B, 10) float32 softmax probabilities
    """
    B = x_nchw.shape[0]

    # nn.Flatten only — x stays f32 and unpadded; the kernel streams it raw.
    x = x_nchw.reshape(B, IN_FEATURES)

    # Weights resident in VMEM: bf16, w2 zero-padded to a lane-dense 128 width.
    w1b = w1.astype(jnp.bfloat16)                                    # (784, 256)
    w2p = jnp.pad(w2.astype(jnp.bfloat16),
                  ((0, 0), (0, OUT_PAD - OUT_FEATURES)))             # (256, 128)
    b1_2d = b1.reshape(1, HIDDEN).astype(jnp.float32)
    b2_2d = jnp.full((1, OUT_PAD), NEG_BIAS, jnp.float32)
    b2_2d = b2_2d.at[0, :OUT_FEATURES].set(b2.astype(jnp.float32))

    # Batch tiling: adaptive TB (multiple of 8), minimal padding, >=2 tiles
    # for megacore once B >= 512.
    TB, B_pad, n_tiles = _choose_tile(B, _tb_max())
    if B_pad != B:
        x = jnp.pad(x, ((0, B_pad - B), (0, 0)))

    flops = 2 * B_pad * (IN_FEATURES * HIDDEN + HIDDEN * OUT_PAD)
    bytes_accessed = (B_pad * IN_FEATURES * 4          # x stream, f32
                      + w1b.size * 2 + w2p.size * 2    # bf16 weights
                      + b1_2d.size * 4 + b2_2d.size * 4
                      + B_pad * OUT_PAD * 4)           # f32 output writeback

    out = pl.pallas_call(
        ffn_kernel,
        out_shape=jax.ShapeDtypeStruct((B_pad, OUT_PAD), jnp.float32),
        grid=(n_tiles,),
        in_specs=[
            pl.BlockSpec((TB, IN_FEATURES), lambda i: (i, 0)),       # x (streamed)
            pl.BlockSpec((IN_FEATURES, HIDDEN), lambda i: (0, 0)),   # w1 (resident)
            pl.BlockSpec((1, HIDDEN), lambda i: (0, 0)),             # b1 (resident)
            pl.BlockSpec((HIDDEN, OUT_PAD), lambda i: (0, 0)),       # w2 (resident)
            pl.BlockSpec((1, OUT_PAD), lambda i: (0, 0)),            # b2 (resident)
        ],
        out_specs=pl.BlockSpec((TB, OUT_PAD), lambda i: (i, 0)),
        compiler_params=pltpu.CompilerParams(
            dimension_semantics=("parallel",),
            vmem_limit_bytes=32 << 20,
        ),
        cost_estimate=pl.CostEstimate(
            flops=flops,
            transcendentals=B_pad * OUT_PAD,
            bytes_accessed=bytes_accessed,
        ),
    )(x, w1b, b1_2d, w2p, b2_2d)

    return out[:B, :OUT_FEATURES]


def init_params(key):
    """Mimics torch.nn.Linear default init: U(-1/sqrt(fan_in), 1/sqrt(fan_in))."""
    k1, k2, k3, k4 = jax.random.split(key, 4)
    bound1 = 1.0 / (IN_FEATURES ** 0.5)
    bound2 = 1.0 / (HIDDEN ** 0.5)
    w1 = jax.random.uniform(k1, (IN_FEATURES, HIDDEN), jnp.float32, -bound1, bound1)
    b1 = jax.random.uniform(k2, (HIDDEN,), jnp.float32, -bound1, bound1)
    w2 = jax.random.uniform(k3, (HIDDEN, OUT_FEATURES), jnp.float32, -bound2, bound2)
    b2 = jax.random.uniform(k4, (OUT_FEATURES,), jnp.float32, -bound2, bound2)
    return w1, b1, w2, b2


def reference_forward(x_nchw, w1, b1, w2, b2):
    """Pure-JAX reference using the same bf16 rounding of x / weights / h."""
    B = x_nchw.shape[0]
    xr = x_nchw.reshape(B, -1).astype(jnp.bfloat16).astype(jnp.float32)
    w1r = w1.astype(jnp.bfloat16).astype(jnp.float32)
    w2r = w2.astype(jnp.bfloat16).astype(jnp.float32)
    h = jnp.maximum(
        jnp.dot(xr, w1r, precision=jax.lax.Precision.HIGHEST) + b1, 0.0)
    h = h.astype(jnp.bfloat16).astype(jnp.float32)
    logits = jnp.dot(h, w2r, precision=jax.lax.Precision.HIGHEST) + b2
    return jax.nn.softmax(logits, axis=1)


if __name__ == "__main__":
    key = jax.random.PRNGKey(0)
    k_x, k_p = jax.random.split(key)
    B = 8
    x = jax.random.normal(k_x, (B, 1, 28, 28), jnp.float32)  # NCHW like MNIST
    w1, b1, w2, b2 = init_params(k_p)

    out = fedd_forward_net(x, w1, b1, w2, b2)
    out = jax.block_until_ready(out)

    assert out.shape == (B, OUT_FEATURES)
    # softmax rows sum to 1
    assert jnp.allclose(jnp.sum(out, axis=1), 1.0, atol=1e-5)
    # matches pure-JAX reference (same bf16 rounding of inputs)
    ref = reference_forward(x, w1, b1, w2, b2)
    assert jnp.allclose(out, ref, atol=5e-4), float(jnp.max(jnp.abs(out - ref)))
    print("KERNEL_OK")
</pallas_src>

<mosaic_0001>
module attributes {stable_mosaic.version = 11 : i64} {
  func.func @ffn_kernel(%arg0: i32, %arg1: memref<8x784xf32, #tpu.memory_space<vmem>>, %arg2: memref<784x256xbf16, #tpu.memory_space<vmem>>, %arg3: memref<1x256xf32, #tpu.memory_space<vmem>>, %arg4: memref<256x128xbf16, #tpu.memory_space<vmem>>, %arg5: memref<1x128xf32, #tpu.memory_space<vmem>>, %arg6: memref<8x128xf32, #tpu.memory_space<vmem>>) attributes {dimension_semantics = [#tpu.dimension_semantics<parallel>], iteration_bounds = array<i64: 1>, scalar_prefetch = 0 : i64, scratch_operands = 0 : i64, tpu.core_type = #tpu.core_type<tc>, window_params = [{transform_indices = @transform_0, window_bounds = array<i64: 8, 784>}, {pipeline_mode = #tpu.pipeline_mode<synchronous>, transform_indices = @transform_1, window_bounds = array<i64: 784, 256>}, {pipeline_mode = #tpu.pipeline_mode<synchronous>, transform_indices = @transform_2, window_bounds = array<i64: 1, 256>}, {pipeline_mode = #tpu.pipeline_mode<synchronous>, transform_indices = @transform_3, window_bounds = array<i64: 256, 128>}, {pipeline_mode = #tpu.pipeline_mode<synchronous>, transform_indices = @transform_4, window_bounds = array<i64: 1, 128>}, {transform_indices = @transform_5, window_bounds = array<i64: 8, 128>}]} {
    %c0 = arith.constant 0 : index
    %c0_0 = arith.constant 0 : index
    %0 = vector.load %arg1[%c0, %c0_0] : memref<8x784xf32, #tpu.memory_space<vmem>>, vector<8x784xf32>
    %1 = arith.truncf %0 : vector<8x784xf32> to vector<8x784xbf16>
    %c0_1 = arith.constant 0 : index
    %c0_2 = arith.constant 0 : index
    %2 = vector.load %arg2[%c0_1, %c0_2] : memref<784x256xbf16, #tpu.memory_space<vmem>>, vector<784x256xbf16>
    %cst = arith.constant dense<0.000000e+00> : vector<8x256xf32>
    %3 = tpu.matmul %1, %2, %cst {dimension_numbers = #tpu.dot_dimension_numbers<[1], [0], [0], [1], [0, 0, 1, 1], [], []>} : vector<8x784xbf16>, vector<784x256xbf16>, vector<8x256xf32> -> vector<8x256xf32>
    %c0_3 = arith.constant 0 : index
    %c0_4 = arith.constant 0 : index
    %4 = vector.load %arg3[%c0_3, %c0_4] : memref<1x256xf32, #tpu.memory_space<vmem>>, vector<1x256xf32>
    %5 = vector.broadcast %4 : vector<1x256xf32> to vector<8x256xf32>
    %6 = arith.addf %3, %5 : vector<8x256xf32>
    %cst_5 = arith.constant 0.000000e+00 : f32
    %7 = vector.broadcast %cst_5 : f32 to vector<8x256xf32>
    %8 = arith.maximumf %6, %7 : vector<8x256xf32>
    %9 = arith.truncf %8 : vector<8x256xf32> to vector<8x256xbf16>
    %c0_6 = arith.constant 0 : index
    %c0_7 = arith.constant 0 : index
    %10 = vector.load %arg4[%c0_6, %c0_7] : memref<256x128xbf16, #tpu.memory_space<vmem>>, vector<256x128xbf16>
    %cst_8 = arith.constant dense<0.000000e+00> : vector<8x128xf32>
    %11 = tpu.matmul %9, %10, %cst_8 {dimension_numbers = #tpu.dot_dimension_numbers<[1], [0], [0], [1], [0, 0, 1, 1], [], []>} : vector<8x256xbf16>, vector<256x128xbf16>, vector<8x128xf32> -> vector<8x128xf32>
    %c0_9 = arith.constant 0 : index
    %c0_10 = arith.constant 0 : index
    %12 = vector.load %arg5[%c0_9, %c0_10] : memref<1x128xf32, #tpu.memory_space<vmem>>, vector<1x128xf32>
    %13 = vector.broadcast %12 : vector<1x128xf32> to vector<8x128xf32>
    %14 = arith.addf %11, %13 : vector<8x128xf32>
    %cst_11 = arith.constant dense<0xFF800000> : vector<8xf32>
    %15 = vector.multi_reduction <maximumf>, %14, %cst_11 [1] : vector<8x128xf32> to vector<8xf32>
    %16 = vector.shape_cast %15 : vector<8xf32> to vector<8x1xf32>
    %17 = vector.broadcast %16 : vector<8x1xf32> to vector<8x128xf32>
    %18 = arith.subf %14, %17 : vector<8x128xf32>
    %19 = math.exp %18 : vector<8x128xf32>
    %cst_12 = arith.constant dense<0.000000e+00> : vector<8xf32>
    %20 = vector.multi_reduction <add>, %19, %cst_12 [1] : vector<8x128xf32> to vector<8xf32>
    %21 = vector.shape_cast %20 : vector<8xf32> to vector<8x1xf32>
    %22 = tpu.reciprocal %21 : vector<8x1xf32> -> vector<8x1xf32>
    %23 = vector.broadcast %22 : vector<8x1xf32> to vector<8x128xf32>
    %24 = arith.mulf %19, %23 : vector<8x128xf32>
    %c0_13 = arith.constant 0 : index
    %c0_14 = arith.constant 0 : index
    %25 = vector.load %arg6[%c0_13, %c0_14] : memref<8x128xf32, #tpu.memory_space<vmem>>, vector<8x128xf32>
    tpu.vector_store %arg6[%c0_13, %c0_14], %24 {strides = array<i32>} : memref<8x128xf32, #tpu.memory_space<vmem>>, vector<8x128xf32>,
    return
  }
  func.func @transform_0(%arg0: i32) -> (i32, i32) {
    %c0_i32 = arith.constant 0 : i32
    %c0_i32_0 = arith.constant 0 : i32
    return %arg0, %c0_i32 : i32, i32
  }
  func.func @transform_1(%arg0: i32) -> (i32, i32) {
    %c0_i32 = arith.constant 0 : i32
    %c0_i32_0 = arith.constant 0 : i32
    %c0_i32_1 = arith.constant 0 : i32
    return %c0_i32, %c0_i32_0 : i32, i32
  }
  func.func @transform_2(%arg0: i32) -> (i32, i32) {
    %c0_i32 = arith.constant 0 : i32
    %c0_i32_0 = arith.constant 0 : i32
    %c0_i32_1 = arith.constant 0 : i32
    return %c0_i32, %c0_i32_0 : i32, i32
  }
  func.func @transform_3(%arg0: i32) -> (i32, i32) {
    %c0_i32 = arith.constant 0 : i32
    %c0_i32_0 = arith.constant 0 : i32
    %c0_i32_1 = arith.constant 0 : i32
    return %c0_i32, %c0_i32_0 : i32, i32
  }
  func.func @transform_4(%arg0: i32) -> (i32, i32) {
    %c0_i32 = arith.constant 0 : i32
    %c0_i32_0 = arith.constant 0 : i32
    %c0_i32_1 = arith.constant 0 : i32
    return %c0_i32, %c0_i32_0 : i32, i32
  }
  func.func @transform_5(%arg0: i32) -> (i32, i32) {
    %c0_i32 = arith.constant 0 : i32
    %c0_i32_0 = arith.constant 0 : i32
    return %arg0, %c0_i32 : i32, i32
  }
}

</mosaic_0001>

<bundles_post_ra>
// kernel: tpu_custom_call.1
= control target key start
LH: loop header
LB: loop body
LE: loop exit
PB: predicated region body
PF: predicated region fallthrough
CT: control target
= control target key end

     0   :  { %10 = vsyncpa [#allocation3], 0  ;;  %s1880_s0 = inlined_call_operand.hbm [shape: f32[8,784], index: 0, kind: input, shape index: {}]   ;;  %s1881_s1 = inlined_call_operand.hbm [shape: bf16[784,256], index: 1, kind: input, shape index: {}]   ;;  %s1882_s2 = inlined_call_operand.hbm [shape: f32[1,256], index: 2, kind: input, shape index: {}]   ;;  %s1883_s3 = inlined_call_operand.hbm [shape: bf16[256,128], index: 3, kind: input, shape index: {}]   ;;  %s1884_s4 = inlined_call_operand.vmem [shape: f32[1,128], index: 4, kind: input, shape index: {}]   ;;  %s1885_s5 = inlined_call_operand.hbm [shape: f32[8,128], index: 5, kind: output, shape index: {}]  }
   0x1   :  { %11 = vsyncpa [#allocation6], 0 }
   0x2   :  { %12 = vsyncpa [#allocation9], 0  ;;  %s29_s20 = sshll.u32 %s1881_s1, 4  ;;  %s30_s20 = int_to_ptr.hbm [resolvable:$true] %s29_s20 }
   0x3   :  { %13 = vsyncpa [#allocation4], 0  ;;  %s1793_s21 = smov [#allocation5]   ;;  %s19_s25 = sshll.u32 %s1880_s0, 4  ;;  %s20_s25 = int_to_ptr.hbm [resolvable:$true] %s19_s25 }
   0x4   :  { %s31_s22 = sshll.u32 %s1793_s21, 4  ;;  %s1794_s26 = smov 128   ;;  %s32_s22 = int_to_ptr.vmem [resolvable:$true] %s31_s22 }
   0x5   :  { %s1795_s27 = smov 8   ;;  %s1796_s28 = smov [#allocation2]  }
   0x6   :  { %37 = dma.hbm_to_vmem [thread:$0]  %s30_s20, 12544, %s32_s22, [#allocation6], %s1794_s26, %s1794_s26, %s1795_s27  }
   0x7   :  { %s21_s29 = sshll.u32 %s1796_s28, 4  ;;  %s43_s7 = sshll.u32 %s1882_s2, 4  ;;  %s22_s29 = int_to_ptr.vmem [resolvable:$true] %s21_s29  ;;  %s44_s7 = int_to_ptr.hbm [resolvable:$true] %s43_s7 }
   0x8   :  { %24 = dma.hbm_to_vmem [thread:$0]  %s20_s25, 896, %s22_s29, [#allocation3]  }
   0x9   :  { %s53_s9 = sshll.u32 %s1883_s3, 4  ;;  %s1797_s10 = smov [#allocation7]   ;;  %s54_s9 = int_to_ptr.hbm [resolvable:$true] %s53_s9 }
   0xa   :  { %s45_s11 = sshll.u32 %s1797_s10, 4  ;;  %s1798_s0 = smov [#allocation8]   ;;  %s46_s11 = int_to_ptr.vmem [resolvable:$true] %s45_s11 }
   0xb   :  { %48 = dma.hbm_to_vmem [thread:$0]  %s44_s7, 32, %s46_s11, [#allocation6]  }
   0xc   :  { %s55_s12 = sshll.u32 %s1798_s0, 4  ;;  %s1799_s13 = smov 64   ;;  %s56_s12 = int_to_ptr.vmem [resolvable:$true] %s55_s12 }
   0xd   :  { %s1800_s14 = smov 4  }
   0xe   :  { %61 = dma.hbm_to_vmem [thread:$0]  %s54_s9, 2048, %s56_s12, [#allocation9], %s1799_s13, %s1799_s13, %s1800_s14  }
   0xf   :  { %1785 = dma.done.wait [#allocation3], 896  }
  0x10   :  { %1786 = vsyncadd [#allocation3], 4294966400 }
  0x11   :  { %1787 = dma.done.wait [#allocation6], 12576  }
  0x12   :  { %1788 = vsyncadd [#allocation6], 4294954720 }
  0x13   :  { %1789 = dma.done.wait [#allocation9], 2048  }
  0x14   :  { %1790 = vsyncadd [#allocation9], 4294965248  ;;  %v1137_v0 = vld [vmem:[#allocation5 + $0x70] sm:$0xf]  ;;  %v1552_v1 = vld [vmem:[#allocation5 + $0x74] sm:$0xf0] }
  0x15   :  { %v1265_v2 = vld [vmem:[#allocation5 + $0x170] sm:$0xf]  ;;  %v1138_v3 = vor.u32 %v1552_v1, %v1137_v0  ;;  %v1584_v4 = vld [vmem:[#allocation5 + $0x174] sm:$0xf0]  ;;  %v1129_v11 = vld [vmem:[#allocation5 + $0x60] sm:$0xf] }
  0x16   :  { %v1329_v5 = vld [vmem:[#allocation5 + $0x1f0] sm:$0xf]  ;;  %v1600_v6 = vld [vmem:[#allocation5 + $0x1f4] sm:$0xf0]  ;;  %v1266_v7 = vor.u32 %v1584_v4, %v1265_v2  ;;  %v1550_v13 = vld [vmem:[#allocation5 + $0x64] sm:$0xf0] }
  0x17   :  { %v1330_v8 = vor.u32 %v1600_v6, %v1329_v5  ;;  %v1201_v9 = vld [vmem:[#allocation5 + $0xf0] sm:$0xf]  ;;  %v1568_v10 = vld [vmem:[#allocation5 + $0xf4] sm:$0xf0]  ;;  %693 = vmatpush.bf16.msra.mxu0 %v1138_v3  ;;  %v1257_v14 = vld [vmem:[#allocation5 + $0x160] sm:$0xf]  ;;  %v1130_v16 = vor.u32 %v1550_v13, %v1129_v11 }
  0x18   :  { %v1202_v12 = vor.u32 %v1568_v10, %v1201_v9  ;;  %v1582_v15 = vld [vmem:[#allocation5 + $0x164] sm:$0xf0]  ;;  %719 = vmatpush.bf16.msra.mxu2 %v1266_v7  ;;  %v1321_v18 = vld [vmem:[#allocation5 + $0x1e0] sm:$0xf]  ;;  %v1121_v23 = vld [vmem:[#allocation5 + $0x50] sm:$0xf] }
  0x19   :  { %732 = vmatpush.bf16.msra.mxu3 %v1330_v8  ;;  %v1258_v17 = vor.u32 %v1582_v15, %v1257_v14  ;;  %v1598_v19 = vld [vmem:[#allocation5 + $0x1e4] sm:$0xf0]  ;;  %v1193_v20 = vld [vmem:[#allocation5 + $0xe0] sm:$0xf]  ;;  %v1548_v24 = vld [vmem:[#allocation5 + $0x54] sm:$0xf0] }
  0x1a   :  { %706 = vmatpush.bf16.msra.mxu1 %v1202_v12  ;;  %v1322_v21 = vor.u32 %v1598_v19, %v1321_v18  ;;  %v1566_v22 = vld [vmem:[#allocation5 + $0xe4] sm:$0xf0]  ;;  %v1249_v26 = vld [vmem:[#allocation5 + $0x150] sm:$0xf]  ;;  %v1580_v27 = vld [vmem:[#allocation5 + $0x154] sm:$0xf0]  ;;  %v1122_v29 = vor.u32 %v1548_v24, %v1121_v23 }
  0x1b   :  { %v1194_v25 = vor.u32 %v1566_v22, %v1193_v20  ;;  %v1313_v28 = vld [vmem:[#allocation5 + $0x1d0] sm:$0xf]  ;;  %694 = vmatpush.bf16.msra.mxu0 %v1130_v16  ;;  %v1596_v30 = vld [vmem:[#allocation5 + $0x1d4] sm:$0xf0]  ;;  %v1250_v33 = vor.u32 %v1580_v27, %v1249_v26  ;;  %v1113_v35 = vld [vmem:[#allocation5 + $0x40] sm:$0xf] }
  0x1c   :  { %v1185_v31 = vld [vmem:[#allocation5 + $0xd0] sm:$0xf]  ;;  %v1564_v32 = vld [vmem:[#allocation5 + $0xd4] sm:$0xf0]  ;;  %720 = vmatpush.bf16.msra.mxu2 %v1258_v17  ;;  %v1314_v34 = vor.u32 %v1596_v30, %v1313_v28  ;;  %v1546_v36 = vld [vmem:[#allocation5 + $0x44] sm:$0xf0] }
  0x1d   :  { %733 = vmatpush.bf16.msra.mxu3 %v1322_v21  ;;  %v1241_v37 = vld [vmem:[#allocation5 + $0x140] sm:$0xf]  ;;  %v1186_v38 = vor.u32 %v1564_v32, %v1185_v31  ;;  %v1578_v39 = vld [vmem:[#allocation5 + $0x144] sm:$0xf0]  ;;  %v1114_v44 = vor.u32 %v1546_v36, %v1113_v35  ;;  %v1105_v47 = vld [vmem:[#allocation5 + $0x30] sm:$0xf] }
  0x1e   :  { %707 = vmatpush.bf16.msra.mxu1 %v1194_v25  ;;  %v1305_v40 = vld [vmem:[#allocation5 + $0x1c0] sm:$0xf]  ;;  %v1594_v41 = vld [vmem:[#allocation5 + $0x1c4] sm:$0xf0]  ;;  %v1242_v45 = vor.u32 %v1578_v39, %v1241_v37  ;;  %v1544_v48 = vld [vmem:[#allocation5 + $0x34] sm:$0xf0] }
  0x1f   :  { %v1177_v42 = vld [vmem:[#allocation5 + $0xc0] sm:$0xf]  ;;  %v1562_v43 = vld [vmem:[#allocation5 + $0xc4] sm:$0xf0]  ;;  %695 = vmatpush.bf16.msra.mxu0 %v1122_v29  ;;  %v1306_v46 = vor.u32 %v1594_v41, %v1305_v40  ;;  %v1233_v49 = vld [vmem:[#allocation5 + $0x130] sm:$0xf]  ;;  %v1106_v56 = vor.u32 %v1544_v48, %v1105_v47 }
  0x20   :  { %721 = vmatpush.bf16.msra.mxu2 %v1250_v33  ;;  %v1178_v50 = vor.u32 %v1562_v43, %v1177_v42  ;;  %v1576_v51 = vld [vmem:[#allocation5 + $0x134] sm:$0xf0]  ;;  %v1297_v52 = vld [vmem:[#allocation5 + $0x1b0] sm:$0xf]  ;;  %v1097_v59 = vld [vmem:[#allocation5 + $0x20] sm:$0xf] }
  0x21   :  { %734 = vmatpush.bf16.msra.mxu3 %v1314_v34  ;;  %v1592_v53 = vld [vmem:[#allocation5 + $0x1b4] sm:$0xf0]  ;;  %v1169_v54 = vld [vmem:[#allocation5 + $0xb0] sm:$0xf]  ;;  %v1234_v57 = vor.u32 %v1576_v51, %v1233_v49  ;;  %v1542_v60 = vld [vmem:[#allocation5 + $0x24] sm:$0xf0] }
  0x22   :  { %708 = vmatpush.bf16.msra.mxu1 %v1186_v38  ;;  %v1560_v55 = vld [vmem:[#allocation5 + $0xb4] sm:$0xf0]  ;;  %v1298_v58 = vor.u32 %v1592_v53, %v1297_v52  ;;  %v1225_v61 = vld [vmem:[#allocation5 + $0x120] sm:$0xf]  ;;  %v1574_v63 = vld [vmem:[#allocation5 + $0x124] sm:$0xf0]  ;;  %v1098_v4 = vor.u32 %v1542_v60, %v1097_v59 }
  0x23   :  { %696 = vmatpush.bf16.msra.mxu0 %v1114_v44  ;;  %v1170_v62 = vor.u32 %v1560_v55, %v1169_v54  ;;  %v1289_v0 = vld [vmem:[#allocation5 + $0x1a0] sm:$0xf]  ;;  %v1590_v1 = vld [vmem:[#allocation5 + $0x1a4] sm:$0xf0]  ;;  %v1226_v5 = vor.u32 %v1574_v63, %v1225_v61  ;;  %v1089_v7 = vld [vmem:[#allocation5 + $0x10] sm:$0xf] }
  0x24   :  { %722 = vmatpush.bf16.msra.mxu2 %v1242_v45  ;;  %v1161_v2 = vld [vmem:[#allocation5 + $0xa0] sm:$0xf]  ;;  %v1558_v3 = vld [vmem:[#allocation5 + $0xa4] sm:$0xf0]  ;;  %v1290_v6 = vor.u32 %v1590_v1, %v1289_v0  ;;  %v1540_v8 = vld [vmem:[#allocation5 + $0x14] sm:$0xf0] }
  0x25   :  { %735 = vmatpush.bf16.msra.mxu3 %v1306_v46  ;;  %v1217_v9 = vld [vmem:[#allocation5 + $0x110] sm:$0xf]  ;;  %v1162_v10 = vor.u32 %v1558_v3, %v1161_v2  ;;  %v1572_v11 = vld [vmem:[#allocation5 + $0x114] sm:$0xf0]  ;;  %v1090_v16 = vor.u32 %v1540_v8, %v1089_v7  ;;  %v1081_v17 = vld [vmem:[#allocation5] sm:$0xf] }
  0x26   :  { %709 = vmatpush.bf16.msra.mxu1 %v1178_v50  ;;  %v1281_v12 = vld [vmem:[#allocation5 + $0x190] sm:$0xf]  ;;  %v1588_v13 = vld [vmem:[#allocation5 + $0x194] sm:$0xf0]  ;;  %v1538_v18 = vld [vmem:[#allocation5 + $0x4] sm:$0xf0]  ;;  %v1218_v20 = vor.u32 %v1572_v11, %v1217_v9 }
  0x27   :  { %697 = vmatpush.bf16.msra.mxu0 %v1106_v56  ;;  %v1153_v14 = vld [vmem:[#allocation5 + $0x90] sm:$0xf]  ;;  %v1556_v15 = vld [vmem:[#allocation5 + $0x94] sm:$0xf0]  ;;  %v1209_v19 = vld [vmem:[#allocation5 + $0x100] sm:$0xf]  ;;  %v1282_v21 = vor.u32 %v1588_v13, %v1281_v12  ;;  %v1082_v32 = vor.u32 %v1538_v18, %v1081_v17 }
  0x28   :  { %723 = vmatpush.bf16.msra.mxu2 %v1234_v57  ;;  %v1570_v22 = vld [vmem:[#allocation5 + $0x104] sm:$0xf0]  ;;  %v1273_v23 = vld [vmem:[#allocation5 + $0x180] sm:$0xf]  ;;  %v1154_v25 = vor.u32 %v1556_v15, %v1153_v14  ;;  %v1393_v26 = vld [vmem:[#allocation5 + $0x270] sm:$0xf] }
  0x29   :  { %736 = vmatpush.bf16.msra.mxu3 %v1298_v58  ;;  %v1586_v24 = vld [vmem:[#allocation5 + $0x184] sm:$0xf0]  ;;  %v1616_v27 = vld [vmem:[#allocation5 + $0x274] sm:$0xf0]  ;;  %v1551_v28 = vld [vmem:[#allocation5 + $0x74] sm:$0xf]  ;;  %v1210_v36 = vor.u32 %v1570_v22, %v1209_v19 }
  0x2a   :  { %710 = vmatpush.bf16.msra.mxu1 %v1170_v62  ;;  %v1139_v29 = vld [vmem:[#allocation5 + $0x78] sm:$0xf0]  ;;  %v1145_v30 = vld [vmem:[#allocation5 + $0x80] sm:$0xf]  ;;  %v1554_v31 = vld [vmem:[#allocation5 + $0x84] sm:$0xf0]  ;;  %v1274_v37 = vor.u32 %v1586_v24, %v1273_v23  ;;  %v1394_v41 = vor.u32 %v1616_v27, %v1393_v26 }
  0x2b   :  { %698 = vmatpush.bf16.msra.mxu0 %v1098_v4  ;;  %v83_v33 = vld [vmem:[#allocation2 + $0x10] sm:$0xff]  ;;  %v1465_v34 = vld [vmem:[#allocation5 + $0x300] sm:$0xf]  ;;  %v1634_v35 = vld [vmem:[#allocation5 + $0x304] sm:$0xf0]  ;;  %v1142_v42 = vor.u32 %v1551_v28, %v1139_v29  ;;  %v1146_v46 = vor.u32 %v1554_v31, %v1145_v30  ;;  %vm689_vm0 = vcmask 130048  }
  0x2c   :  { %724 = vmatpush.bf16.msra.mxu2 %v1226_v5  ;;  %v1457_v38 = vld [vmem:[#allocation5 + $0x2f0] sm:$0xf]  ;;  %v1632_v39 = vld [vmem:[#allocation5 + $0x2f4] sm:$0xf0]  ;;  %v1567_v40 = vld [vmem:[#allocation5 + $0xf4] sm:$0xf]  ;;  %v1466_v47 = vor.u32 %v1634_v35, %v1465_v34  ;;  %v1844_v51 = vpack.c.bf16 %v83_v33, %v83_v33 }
  0x2d   :  { %737 = vmatpush.bf16.msra.mxu3 %v1290_v6  ;;  %v1203_v43 = vld [vmem:[#allocation5 + $0xf8] sm:$0xf0]  ;;  %v1385_v44 = vld [vmem:[#allocation5 + $0x260] sm:$0xf]  ;;  %v81_v45 = vld [vmem:[#allocation2] sm:$0xff]  ;;  %v1458_v52 = vor.u32 %v1632_v39, %v1457_v38  ;;  %s1067_s18 = sshll.u32 %s1885_s5, 4  ;;  %s1068_s18 = int_to_ptr.hbm [resolvable:$true] %s1067_s18 }
  0x2e   :  { %711 = vmatpush.bf16.msra.mxu1 %v1162_v10  ;;  %v1614_v48 = vld [vmem:[#allocation5 + $0x264] sm:$0xf0]  ;;  %v1549_v49 = vld [vmem:[#allocation5 + $0x64] sm:$0xf]  ;;  %v1131_v50 = vld [vmem:[#allocation5 + $0x68] sm:$0xf0]  ;;  %v1206_v55 = vor.u32 %v1567_v40, %v1203_v43  ;;  %v1846_v58 = vpack.c.bf16 %v81_v45, %v81_v45 }
  0x2f   :  { %699 = vmatpush.bf16.msra.mxu0 %v1090_v16  ;;  %v84_v53 = vld [vmem:[#allocation2 + $0x18] sm:$0xff]  ;;  %v82_v54 = vld [vmem:[#allocation2 + $0x8] sm:$0xff]  ;;  %v1630_v57 = vld [vmem:[#allocation5 + $0x2e4] sm:$0xf0]  ;;  %v1386_v59 = vor.u32 %v1614_v48, %v1385_v44  ;;  %v1134_v60 = vor.u32 %v1549_v49, %v1131_v50 }
  0x30   :  { %725 = vmatpush.bf16.msra.mxu2 %v1218_v20  ;;  %v1449_v56 = vld [vmem:[#allocation5 + $0x2e0] sm:$0xf]  ;;  %v1565_v61 = vld [vmem:[#allocation5 + $0xe4] sm:$0xf]  ;;  %v1195_v62 = vld [vmem:[#allocation5 + $0xe8] sm:$0xf0]  ;;  %v1848_v3 = vpack.c.bf16 %v84_v53, %v84_v53  ;;  %v1850_v4 = vpack.c.bf16 %v82_v54, %v82_v54 }
  0x31   :  { %738 = vmatpush.bf16.msra.mxu3 %v1282_v21  ;;  %v1377_v63 = vld [vmem:[#allocation5 + $0x250] sm:$0xf]  ;;  %v1612_v0 = vld [vmem:[#allocation5 + $0x254] sm:$0xf0]  ;;  %v1547_v1 = vld [vmem:[#allocation5 + $0x54] sm:$0xf]  ;;  %v1450_v5 = vor.u32 %v1630_v57, %v1449_v56  ;;  %v1198_v6 = vor.u32 %v1565_v61, %v1195_v62 }
  0x32   :  { %712 = vmatpush.bf16.msra.mxu1 %v1154_v25  ;;  %v1123_v2 = vld [vmem:[#allocation5 + $0x58] sm:$0xf0]  ;;  %v1441_v7 = vld [vmem:[#allocation5 + $0x2d0] sm:$0xf]  ;;  %v1628_v8 = vld [vmem:[#allocation5 + $0x2d4] sm:$0xf0]  ;;  %v1378_v9 = vor.u32 %v1612_v0, %v1377_v63 }
  0x33   :  { %700 = vmatpush.bf16.msra.mxu0 %v1082_v32  ;;  %v1126_v10 = vor.u32 %v1547_v1, %v1123_v2  ;;  %v1563_v11 = vld [vmem:[#allocation5 + $0xd4] sm:$0xf]  ;;  %v1187_v12 = vld [vmem:[#allocation5 + $0xd8] sm:$0xf0]  ;;  %v1369_v13 = vld [vmem:[#allocation5 + $0x240] sm:$0xf]  ;;  %v1442_v17 = vor.u32 %v1628_v8, %v1441_v7 }
  0x34   :  { %726 = vmatpush.bf16.msra.mxu2 %v1210_v36  ;;  %v1610_v14 = vld [vmem:[#allocation5 + $0x244] sm:$0xf0]  ;;  %v1545_v15 = vld [vmem:[#allocation5 + $0x44] sm:$0xf]  ;;  %v1115_v16 = vld [vmem:[#allocation5 + $0x48] sm:$0xf0]  ;;  %v1190_v18 = vor.u32 %v1563_v11, %v1187_v12 }
  0x35   :  { %739 = vmatpush.bf16.msra.mxu3 %v1274_v37  ;;  %v1433_v19 = vld [vmem:[#allocation5 + $0x2c0] sm:$0xf]  ;;  %v1626_v20 = vld [vmem:[#allocation5 + $0x2c4] sm:$0xf0]  ;;  %v1370_v21 = vor.u32 %v1610_v14, %v1369_v13  ;;  %v1118_v22 = vor.u32 %v1545_v15, %v1115_v16  ;;  %v1561_v23 = vld [vmem:[#allocation5 + $0xc4] sm:$0xf] }
  0x36   :  { %713 = vmatpush.bf16.msra.mxu1 %v1146_v46  ;;  %701 = vmatmul.bf16.vlgmr.msra.gmra.mxu0 %v1846_v58  ;;  %v1179_v24 = vld [vmem:[#allocation5 + $0xc8] sm:$0xf0]  ;;  %v1361_v25 = vld [vmem:[#allocation5 + $0x230] sm:$0xf]  ;;  %v1608_v26 = vld [vmem:[#allocation5 + $0x234] sm:$0xf0]  ;;  %v1434_v29 = vor.u32 %v1626_v20, %v1433_v19 }
  0x37   :  { %745 = vmatpush.bf16.msrb.mxu0 %v1394_v41  ;;  %727 = vmatmul.bf16.vlgmr.msra.gmra.mxu2 %v1844_v51  ;;  %v1543_v27 = vld [vmem:[#allocation5 + $0x34] sm:$0xf]  ;;  %v1107_v28 = vld [vmem:[#allocation5 + $0x38] sm:$0xf0]  ;;  %v1182_v30 = vor.u32 %v1561_v23, %v1179_v24  ;;  %v1425_v31 = vld [vmem:[#allocation5 + $0x2b0] sm:$0xf]  ;;  %v1362_v34 = vor.u32 %v1608_v26, %v1361_v25 }
  0x38   :  { %778 = vmatpush.bf16.msrb.mxu2 %v1466_v47  ;;  %740 = vmatmul.bf16.vlgmr.msra.gmra.mxu3 %v1848_v3  ;;  %v1624_v32 = vld [vmem:[#allocation5 + $0x2b4] sm:$0xf0]  ;;  %v1110_v35 = vor.u32 %v1543_v27, %v1107_v28  ;;  %v1559_v36 = vld [vmem:[#allocation5 + $0xb4] sm:$0xf]  ;;  %v1171_v37 = vld [vmem:[#allocation5 + $0xb8] sm:$0xf0] }
  0x39   :  { %784 = vmatpush.bf16.msrb.mxu3 %v1142_v42  ;;  %714 = vmatmul.bf16.vlgmr.msra.gmra.mxu1 %v1850_v4  ;;  %v87_v33 = vld [vmem:[#allocation2 + $0x30] sm:$0xff]  ;;  %v1353_v38 = vld [vmem:[#allocation5 + $0x220] sm:$0xf]  ;;  %v1606_v39 = vld [vmem:[#allocation5 + $0x224] sm:$0xf0]  ;;  %v1426_v42 = vor.u32 %v1624_v32, %v1425_v31  ;;  %v1174_v44 = vor.u32 %v1559_v36, %v1171_v37 }
  0x3a   :  { %758 = vmatpush.bf16.msrb.mxu1 %v1458_v52  ;;  %v1541_v40 = vld [vmem:[#allocation5 + $0x24] sm:$0xf]  ;;  %v1099_v41 = vld [vmem:[#allocation5 + $0x28] sm:$0xf0]  ;;  %v1856_v43 = vpack.c.bf16 %v87_v33, %v87_v33  ;;  %v1417_v45 = vld [vmem:[#allocation5 + $0x2a0] sm:$0xf]  ;;  %v1354_v47 = vor.u32 %v1606_v39, %v1353_v38 }
  0x3b   :  { %746 = vmatpush.bf16.msrb.mxu0 %v1386_v59  ;;  %v1622_v46 = vld [vmem:[#allocation5 + $0x2a4] sm:$0xf0]  ;;  %v1102_v48 = vor.u32 %v1541_v40, %v1099_v41  ;;  %v1557_v49 = vld [vmem:[#allocation5 + $0xa4] sm:$0xf]  ;;  %v1163_v50 = vld [vmem:[#allocation5 + $0xa8] sm:$0xf0] }
  0x3c   :  { %797 = vmatpush.bf16.msra.mxu2 %v1206_v55  ;;  %v1345_v52 = vld [vmem:[#allocation5 + $0x210] sm:$0xf]  ;;  %v1604_v53 = vld [vmem:[#allocation5 + $0x214] sm:$0xf0]  ;;  %v1539_v54 = vld [vmem:[#allocation5 + $0x14] sm:$0xf]  ;;  %v1418_v56 = vor.u32 %v1622_v46, %v1417_v45  ;;  %v1166_v57 = vor.u32 %v1557_v49, %v1163_v50 }
  0x3d   :  { %785 = vmatpush.bf16.msrb.mxu3 %v1134_v60  ;;  %v1091_v55 = vld [vmem:[#allocation5 + $0x18] sm:$0xf0]  ;;  %v1409_v59 = vld [vmem:[#allocation5 + $0x290] sm:$0xf]  ;;  %v1620_v60 = vld [vmem:[#allocation5 + $0x294] sm:$0xf0]  ;;  %v1346_v62 = vor.u32 %v1604_v53, %v1345_v52 }
  0x3e   :  { %759 = vmatpush.bf16.msrb.mxu1 %v1450_v5  ;;  %v1555_v61 = vld [vmem:[#allocation5 + $0x94] sm:$0xf]  ;;  %v1094_v63 = vor.u32 %v1539_v54, %v1091_v55  ;;  %v1155_v0 = vld [vmem:[#allocation5 + $0x98] sm:$0xf0]  ;;  %v1337_v1 = vld [vmem:[#allocation5 + $0x200] sm:$0xf]  ;;  %v1410_v8 = vor.u32 %v1620_v60, %v1409_v59 }
  0x3f   :  { %747 = vmatpush.bf16.msrb.mxu0 %v1378_v9  ;;  %v1602_v2 = vld [vmem:[#allocation5 + $0x204] sm:$0xf0]  ;;  %v1537_v5 = vld [vmem:[#allocation5 + $0x4] sm:$0xf]  ;;  %v1583_v7 = vld [vmem:[#allocation5 + $0x174] sm:$0xf]  ;;  %v1158_v12 = vor.u32 %v1555_v61, %v1155_v0 }
  0x40   :  { %798 = vmatpush.bf16.msra.mxu2 %v1198_v6  ;;  %v1083_v6 = vld [vmem:[#allocation5 + $0x8] sm:$0xf0]  ;;  %v1267_v9 = vld [vmem:[#allocation5 + $0x178] sm:$0xf0]  ;;  %v1401_v13 = vld [vmem:[#allocation5 + $0x280] sm:$0xf]  ;;  %v1338_v16 = vor.u32 %v1602_v2, %v1337_v1 }
  0x41   :  { %786 = vmatpush.bf16.msrb.mxu3 %v1126_v10  ;;  %v1615_v10 = vld [vmem:[#allocation5 + $0x274] sm:$0xf]  ;;  %v1395_v11 = vld [vmem:[#allocation5 + $0x278] sm:$0xf0]  ;;  %v1618_v14 = vld [vmem:[#allocation5 + $0x284] sm:$0xf0] }
  0x42   :  { %760 = vmatpush.bf16.msrb.mxu1 %v1442_v17  ;;  %v85_v15 = vld [vmem:[#allocation2 + $0x20] sm:$0xff]  ;;  %v1086_v17 = vor.u32 %v1537_v5, %v1083_v6  ;;  %v1599_v20 = vld [vmem:[#allocation5 + $0x1f4] sm:$0xf]  ;;  %v1331_v23 = vld [vmem:[#allocation5 + $0x1f8] sm:$0xf0]  ;;  %v1402_v26 = vor.u32 %v1618_v14, %v1401_v13 }
  0x43   :  { %748 = vmatpush.bf16.msrb.mxu0 %v1370_v21  ;;  %v1147_v19 = vld [vmem:[#allocation5 + $0x88] sm:$0xf0]  ;;  %v1270_v21 = vor.u32 %v1583_v7, %v1267_v9  ;;  %v1631_v24 = vld [vmem:[#allocation5 + $0x2f4] sm:$0xf]  ;;  %v1459_v25 = vld [vmem:[#allocation5 + $0x2f8] sm:$0xf0] }
  0x44   :  { %799 = vmatpush.bf16.msra.mxu2 %v1190_v18  ;;  %v1553_v18 = vld [vmem:[#allocation5 + $0x84] sm:$0xf]  ;;  %v86_v27 = vld [vmem:[#allocation2 + $0x28] sm:$0xff]  ;;  %v1387_v33 = vld [vmem:[#allocation5 + $0x268] sm:$0xf0] }
  0x45   :  { %787 = vmatpush.bf16.msrb.mxu3 %v1118_v22  ;;  %v1398_v22 = vor.u32 %v1615_v10, %v1395_v11  ;;  %v1581_v28 = vld [vmem:[#allocation5 + $0x164] sm:$0xf]  ;;  %v1150_v31 = vor.u32 %v1553_v18, %v1147_v19  ;;  %v1862_v37 = vpack.c.bf16 %v86_v27, %v86_v27  ;;  %v1323_v39 = vld [vmem:[#allocation5 + $0x1e8] sm:$0xf0]  ;;  %v1251_v45 = vld [vmem:[#allocation5 + $0x158] sm:$0xf0] }
  0x46   :  { %761 = vmatpush.bf16.msrb.mxu1 %v1434_v29  ;;  %v1259_v29 = vld [vmem:[#allocation5 + $0x168] sm:$0xf0]  ;;  %v1613_v32 = vld [vmem:[#allocation5 + $0x264] sm:$0xf]  ;;  %v1611_v46 = vld [vmem:[#allocation5 + $0x254] sm:$0xf] }
  0x47   :  { %749 = vmatpush.bf16.msrb.mxu0 %v1362_v34  ;;  %1471 = vmatmul.msk.bf16.vlgmr.msrb.gmra.mxu2 %vm689_vm0, %v1856_v43  ;;  %v1334_v34 = vor.u32 %v1599_v20, %v1331_v23  ;;  %v1597_v36 = vld [vmem:[#allocation5 + $0x1e4] sm:$0xf]  ;;  %v1262_v38 = vor.u32 %v1581_v28, %v1259_v29  ;;  %v1451_v41 = vld [vmem:[#allocation5 + $0x2e8] sm:$0xf0]  ;;  %v1595_v50 = vld [vmem:[#allocation5 + $0x1d4] sm:$0xf] }
  0x48   :  { %800 = vmatpush.bf16.msra.mxu2 %v1182_v30  ;;  %v1860_v30 = vpack.c.bf16 %v85_v15, %v85_v15  ;;  %v1629_v40 = vld [vmem:[#allocation5 + $0x2e4] sm:$0xf]  ;;  %v1315_v53 = vld [vmem:[#allocation5 + $0x1d8] sm:$0xf0]  ;;  %v1627_v54 = vld [vmem:[#allocation5 + $0x2d4] sm:$0xf] }
  0x49   :  { %788 = vmatpush.bf16.msrb.mxu3 %v1110_v35  ;;  %v1462_v35 = vor.u32 %v1631_v24, %v1459_v25  ;;  %v1454_v49 = vor.u32 %v1629_v40, %v1451_v41  ;;  %v1443_v55 = vld [vmem:[#allocation5 + $0x2d8] sm:$0xf0]  ;;  %v1243_v59 = vld [vmem:[#allocation5 + $0x148] sm:$0xf0]  ;;  %v1609_v60 = vld [vmem:[#allocation5 + $0x244] sm:$0xf] }
  0x4a   :  { %762 = vmatpush.bf16.msrb.mxu1 %v1426_v42  ;;  %v1390_v42 = vor.u32 %v1613_v32, %v1387_v33  ;;  %v1371_v61 = vld [vmem:[#allocation5 + $0x248] sm:$0xf0]  ;;  %v1593_v0 = vld [vmem:[#allocation5 + $0x1c4] sm:$0xf]  ;;  %v1235_v9 = vld [vmem:[#allocation5 + $0x138] sm:$0xf0] }
  0x4b   :  { %750 = vmatpush.bf16.msrb.mxu0 %v1354_v47  ;;  %v1379_v47 = vld [vmem:[#allocation5 + $0x258] sm:$0xf0]  ;;  %v1307_v2 = vld [vmem:[#allocation5 + $0x1c8] sm:$0xf0]  ;;  %v1625_v5 = vld [vmem:[#allocation5 + $0x2c4] sm:$0xf]  ;;  %v1374_v7 = vor.u32 %v1609_v60, %v1371_v61 }
  0x4c   :  { %801 = vmatpush.bf16.msra.mxu2 %v1174_v44  ;;  %v1579_v44 = vld [vmem:[#allocation5 + $0x154] sm:$0xf]  ;;  %v1435_v6 = vld [vmem:[#allocation5 + $0x2c8] sm:$0xf0]  ;;  %v1310_v11 = vor.u32 %v1593_v0, %v1307_v2  ;;  %v1299_v14 = vld [vmem:[#allocation5 + $0x1b8] sm:$0xf0] }
  0x4d   :  { %789 = vmatpush.bf16.msrb.mxu3 %v1102_v48  ;;  %v1326_v48 = vor.u32 %v1597_v36, %v1323_v39  ;;  %v1254_v52 = vor.u32 %v1579_v44, %v1251_v45  ;;  %v1607_v10 = vld [vmem:[#allocation5 + $0x234] sm:$0xf]  ;;  %v1573_v18 = vld [vmem:[#allocation5 + $0x124] sm:$0xf]  ;;  %v1227_v19 = vld [vmem:[#allocation5 + $0x128] sm:$0xf0] }
  0x4e   :  { %763 = vmatpush.bf16.msrb.mxu1 %v1418_v56  ;;  %v1382_v56 = vor.u32 %v1611_v46, %v1379_v47  ;;  %v1623_v15 = vld [vmem:[#allocation5 + $0x2b4] sm:$0xf]  ;;  %v1605_v20 = vld [vmem:[#allocation5 + $0x224] sm:$0xf]  ;;  %v1230_v25 = vor.u32 %v1573_v18, %v1227_v19  ;;  %v1419_v28 = vld [vmem:[#allocation5 + $0x2a8] sm:$0xf0] }
  0x4f   :  { %751 = vmatpush.bf16.msrb.mxu0 %v1346_v62  ;;  %v1318_v62 = vor.u32 %v1595_v50, %v1315_v53  ;;  %v1589_v24 = vld [vmem:[#allocation5 + $0x1a4] sm:$0xf]  ;;  %v1219_v32 = vld [vmem:[#allocation5 + $0x118] sm:$0xf0]  ;;  %v1603_v33 = vld [vmem:[#allocation5 + $0x214] sm:$0xf] }
  0x50   :  { %802 = vmatpush.bf16.msra.mxu2 %v1166_v57  ;;  %v1577_v57 = vld [vmem:[#allocation5 + $0x144] sm:$0xf]  ;;  %v1283_v40 = vld [vmem:[#allocation5 + $0x198] sm:$0xf0]  ;;  %v1619_v41 = vld [vmem:[#allocation5 + $0x294] sm:$0xf] }
  0x51   :  { %790 = vmatpush.bf16.msrb.mxu3 %v1094_v63  ;;  %v1446_v63 = vor.u32 %v1627_v54, %v1443_v55  ;;  %v1246_v1 = vor.u32 %v1577_v57, %v1243_v59  ;;  %v1621_v27 = vld [vmem:[#allocation5 + $0x2a4] sm:$0xf]  ;;  %v1211_v46 = vld [vmem:[#allocation5 + $0x108] sm:$0xf0]  ;;  %v1640_v2 = vld [vmem:[#allocation8 + $0x28] sm:$0xff] }
  0x52   :  { %764 = vmatpush.bf16.msrb.mxu1 %v1410_v8  ;;  %v1575_v8 = vld [vmem:[#allocation5 + $0x134] sm:$0xf]  ;;  %v1422_v36 = vor.u32 %v1621_v27, %v1419_v28  ;;  %v1569_v45 = vld [vmem:[#allocation5 + $0x104] sm:$0xf]  ;;  %v1467_v50 = vld [vmem:[#allocation5 + $0x308] sm:$0xf0] }
  0x53   :  { %752 = vmatpush.bf16.msrb.mxu0 %v1338_v16  ;;  %v1238_v13 = vor.u32 %v1575_v8, %v1235_v9  ;;  %v1427_v16 = vld [vmem:[#allocation5 + $0x2b8] sm:$0xf0]  ;;  %v1601_v47 = vld [vmem:[#allocation5 + $0x204] sm:$0xf]  ;;  %v1214_v54 = vor.u32 %v1569_v45, %v1211_v46  ;;  %v1403_v60 = vld [vmem:[#allocation5 + $0x288] sm:$0xf0] }
  0x54   :  { %803 = vmatpush.bf16.msra.mxu2 %v1158_v12  ;;  %v1591_v12 = vld [vmem:[#allocation5 + $0x1b4] sm:$0xf]  ;;  %v1430_v23 = vor.u32 %v1623_v15, %v1427_v16  ;;  %v1585_v55 = vld [vmem:[#allocation5 + $0x184] sm:$0xf]  ;;  %v1642_v0 = vld [vmem:[#allocation8 + $0x38] sm:$0xff] }
  0x55   :  { %791 = vmatpush.bf16.msrb.mxu3 %v1086_v17  ;;  %v1617_v59 = vld [vmem:[#allocation5 + $0x284] sm:$0xf]  ;;  %v1648_v19 = vld [vmem:[#allocation8 + $0x68] sm:$0xff]  ;;  %v1646_v27 = vld [vmem:[#allocation8 + $0x58] sm:$0xff] }
  0x56   :  { %765 = vmatpush.bf16.msrb.mxu1 %v1402_v26  ;;  %753 = vmatmul.bf16.vlgmr.msrb.gmra.mxu0 %v1860_v30  ;;  %v1291_v26 = vld [vmem:[#allocation5 + $0x1a8] sm:$0xf0] }
  0x57   :  { %810 = vmatpush.bf16.msra.mxu0 %v1270_v21  ;;  %v1355_v21 = vld [vmem:[#allocation5 + $0x228] sm:$0xf0] }
  0x58   :  { %804 = vmatpush.bf16.msra.mxu2 %v1150_v31  ;;  %792 = vmatmul.bf16.vlgmr.msrb.gmra.mxu3 %v1846_v58  ;;  %v1438_v58 = vor.u32 %v1625_v5, %v1435_v6  ;;  %v1358_v29 = vor.u32 %v1605_v20, %v1355_v21  ;;  %v1571_v31 = vld [vmem:[#allocation5 + $0x114] sm:$0xf]  ;;  %v1638_v6 = vld [vmem:[#allocation8 + $0x18] sm:$0xff] }
  0x59   :  { %836 = vmatpush.bf16.msra.mxu3 %v1398_v22  ;;  %766 = vmatmul.bf16.vlgmr.msrb.gmra.mxu1 %v1862_v37  ;;  %v1302_v22 = vor.u32 %v1591_v12, %v1299_v14  ;;  %v1222_v39 = vor.u32 %v1571_v31, %v1219_v32  ;;  %v1639_v5 = vld [vmem:[#allocation8 + $0x20] sm:$0xff]  ;;  %v1645_v32 = vld [vmem:[#allocation8 + $0x50] sm:$0xff] }
  0x5a   :  { %823 = vmatpush.bf16.msra.mxu1 %v1334_v34  ;;  %v1347_v34 = vld [vmem:[#allocation5 + $0x218] sm:$0xf0] }
  0x5b   :  { %811 = vmatpush.bf16.msra.mxu0 %v1262_v38  ;;  %805 = vmatmul.bf16.vlgmr.msra.gmra.mxu2 %v1850_v4  ;;  %v1363_v4 = vld [vmem:[#allocation5 + $0x238] sm:$0xf0]  ;;  %v1587_v38 = vld [vmem:[#allocation5 + $0x194] sm:$0xf]  ;;  %v1350_v44 = vor.u32 %v1603_v33, %v1347_v34 }
  0x5c   :  { %849 = vmatpush.bf16.msrb.mxu2 %v1462_v35  ;;  %v1366_v17 = vor.u32 %v1607_v10, %v1363_v4  ;;  %v1294_v35 = vor.u32 %v1589_v24, %v1291_v26  ;;  %v1650_v4 = vld [vmem:[#allocation8 + $0x78] sm:$0xff] }
  0x5d   :  { %837 = vmatpush.bf16.msra.mxu3 %v1390_v42  ;;  %v1411_v42 = vld [vmem:[#allocation5 + $0x298] sm:$0xf0] }
  0x5e   :  { %824 = vmatpush.bf16.msra.mxu1 %v1326_v48  ;;  %v1339_v48 = vld [vmem:[#allocation5 + $0x208] sm:$0xf0]  ;;  %v1414_v53 = vor.u32 %v1619_v41, %v1411_v42 }
  0x5f   :  { %812 = vmatpush.bf16.msra.mxu0 %v1254_v52  ;;  %v1286_v52 = vor.u32 %v1587_v38, %v1283_v40  ;;  %v1342_v57 = vor.u32 %v1601_v47, %v1339_v48  ;;  %v1644_v38 = vld [vmem:[#allocation8 + $0x48] sm:$0xff] }
  0x60   :  { %850 = vmatpush.bf16.msrb.mxu2 %v1454_v49  ;;  %v1633_v49 = vld [vmem:[#allocation5 + $0x304] sm:$0xf] }
  0x61   :  { %838 = vmatpush.bf16.msra.mxu3 %v1382_v56  ;;  %v1275_v56 = vld [vmem:[#allocation5 + $0x188] sm:$0xf0]  ;;  %v1470_v61 = vor.u32 %v1633_v49, %v1467_v50 }
  0x62   :  { %825 = vmatpush.bf16.msra.mxu1 %v1318_v62  ;;  %v1278_v62 = vor.u32 %v1585_v55, %v1275_v56 }
  0x63   :  { %813 = vmatpush.bf16.msra.mxu0 %v1246_v1  ;;  %v1641_v1 = vld [vmem:[#allocation8 + $0x30] sm:$0xff] }
  0x64   :  { %851 = vmatpush.bf16.msrb.mxu2 %v1446_v63  ;;  %v1406_v63 = vor.u32 %v1617_v59, %v1403_v60 }
  0x65   :  { %839 = vmatpush.bf16.msra.mxu3 %v1374_v7 }
  0x66   :  { %826 = vmatpush.bf16.msra.mxu1 %v1310_v11 }
  0x67   :  { %814 = vmatpush.bf16.msra.mxu0 %v1238_v13  ;;  %v1649_v13 = vld [vmem:[#allocation8 + $0x70] sm:$0xff] }
  0x68   :  { %852 = vmatpush.bf16.msrb.mxu2 %v1438_v58 }
  0x69   :  { %840 = vmatpush.bf16.msra.mxu3 %v1366_v17 }
  0x6a   :  { %827 = vmatpush.bf16.msra.mxu1 %v1302_v22  ;;  %v1647_v22 = vld [vmem:[#allocation8 + $0x60] sm:$0xff] }
  0x6b   :  { %815 = vmatpush.bf16.msra.mxu0 %v1230_v25 }
  0x6c   :  { %853 = vmatpush.bf16.msrb.mxu2 %v1430_v23 }
  0x6d   :  { %841 = vmatpush.bf16.msra.mxu3 %v1358_v29 }
  0x6e   :  { %828 = vmatpush.bf16.msra.mxu1 %v1294_v35 }
  0x6f   :  { %816 = vmatpush.bf16.msra.mxu0 %v1222_v39  ;;  %v1643_v39 = vld [vmem:[#allocation8 + $0x40] sm:$0xff] }
  0x70   :  { %854 = vmatpush.bf16.msrb.mxu2 %v1422_v36 }
  0x71   :  { %842 = vmatpush.bf16.msra.mxu3 %v1350_v44 }
  0x72   :  { %829 = vmatpush.bf16.msra.mxu1 %v1286_v52 }
  0x73   :  { %817 = vmatpush.bf16.msra.mxu0 %v1214_v54 }
  0x74   :  { %855 = vmatpush.bf16.msrb.mxu2 %v1414_v53 }
  0x75   :  { %843 = vmatpush.bf16.msra.mxu3 %v1342_v57 }
  0x76   :  { %830 = vmatpush.bf16.msra.mxu1 %v1278_v62  ;;  %818 = vmatmul.bf16.vlgmr.msra.gmra.mxu0 %v1844_v51  ;;  %v1637_v51 = vld [vmem:[#allocation8 + $0x10] sm:$0xff] }
  0x77   :  { %869 = vmatpush.bf16.msrb.mxu0 %v1470_v61 }
  0x78   :  { %844 = vmatmul.bf16.vlgmr.msra.gmra.mxu3 %v1860_v30  ;;  %856 = vmatpush.bf16.msrb.mxu2 %v1406_v63  ;;  %v1636_v30 = vld [vmem:[#allocation8 + $0x8] sm:$0xff] }
  0x79   :  { %831 = vmatmul.bf16.vlgmr.msra.gmra.mxu1 %v1848_v3  ;;  %1024 = vmatpush.bf16.msrb.mxu3 %v1650_v4 }
  0x7a   :  { %1011 = vmatpush.bf16.msrb.mxu1 %v1642_v0 }
  0x7b   :  { %857 = vmatmul.bf16.vlgmr.msrb.gmra.mxu2 %v1862_v37  ;;  %v1635_v37 = vld [vmem:[#allocation8] sm:$0xff] }
  0x7d   :  { %1025 = vmatpush.bf16.msrb.mxu3 %v1649_v13 }
  0x7e   :  { %1012 = vmatpush.bf16.msrb.mxu1 %v1641_v1 }
  0x81   :  { %1026 = vmatpush.bf16.msrb.mxu3 %v1648_v19 }
  0x82   :  { %1013 = vmatpush.bf16.msrb.mxu1 %v1640_v2 }
  0x85   :  { %1027 = vmatpush.bf16.msrb.mxu3 %v1647_v22 }
  0x86   :  { %1472 = vmatmul.msk.bf16.vlgmr.msrb.gmra.mxu0 %vm689_vm0, %v1856_v43  ;;  %1014 = vmatpush.bf16.msrb.mxu1 %v1639_v5  ;;  %v193_v43 = vld [vmem:[#allocation7] sm:$0x3]  ;;  %v1660_v5 = vld [vmem:[%s1884_s4] ss:$0 sm:$0xff]  ;;  %s1801_s4 = smov [#allocation10]  }
  0x87   :  { %v195_v58 = vperm.slane %v193_v43, 0  ;;  %v196_v42 = vperm.slane %v193_v43, 1  ;;  %s1065_s15 = sshll.u32 %s1801_s4, 4  ;;  %s1066_s15 = int_to_ptr.vmem [resolvable:$true] %s1065_s15 }
  0x89   :  { %1028 = vmatpush.bf16.msrb.mxu3 %v1646_v27 }
  0x8a   :  { %1015 = vmatpush.bf16.msrb.mxu1 %v1638_v6 }
  0x8d   :  { %1029 = vmatpush.bf16.msrb.mxu3 %v1645_v32 }
  0x8e   :  { %1016 = vmatpush.bf16.msrb.mxu1 %v1637_v51 }
  0x91   :  { %1030 = vmatpush.bf16.msrb.mxu3 %v1644_v38 }
  0x92   :  { %1017 = vmatpush.bf16.msrb.mxu1 %v1636_v30 }
  0x95   :  { %1031 = vmatpush.bf16.msrb.mxu3 %v1643_v39 }
  0x96   :  { %1018 = vmatpush.bf16.msrb.mxu1 %v1635_v37 }
  0xb3   :  { %v702_v7 = vpop.f32.mrf.mxu0 }
  0xb4   :  { %v703_v14 = vadd.f32 %v702_v7, %v195_v58 }
  0xb6   :  { %v715_v3 = vpop.f32.mrf.mxu1 }
  0xb7   :  { %v716_v16 = vadd.f32 %v715_v3, %v703_v14 }
  0xba   :  { %v728_v8 = vpop.f32.mrf.mxu2 }
  0xbb   :  { %v741_v9 = vpop.f32.mrf.mxu3  ;;  %v704_v10 = vpop.f32.mrf.mxu0  ;;  %v729_v18 = vadd.f32 %v728_v8, %v716_v16 }
  0xbd   :  { %v742_v20 = vadd.f32 %v741_v9, %v729_v18 }
  0xbe   :  { %v717_v11 = vpop.f32.mrf.mxu1 }
  0xc2   :  { %v730_v12 = vpop.f32.mrf.mxu2 }
  0xc3   :  { %v743_v15 = vpop.f32.mrf.mxu3 }
  0xca   :  { %v780_v17 = vpop.f32.mrf.mxu2 }
  0xd2   :  { %v782_v24 = vpop.f32.mrf.mxu2 }
  0xd3   :  { %v754_v21 = vpop.f32.mrf.mxu0 }
  0xd4   :  { %v755_v23 = vadd.f32 %v754_v21, %v742_v20 }
  0xd6   :  { %v767_v25 = vpop.f32.mrf.mxu1 }
  0xd7   :  { %v768_v26 = vadd.f32 %v767_v25, %v755_v23 }
  0xd9   :  { %v781_v28 = vadd.f32 %v780_v17, %v768_v26 }
  0xdb   :  { %v875_v29 = vmax.f32 %v781_v28, 0.0  ;;  %v756_v31 = vpop.f32.mrf.mxu0  ;;  %v793_v35 = vpop.f32.mrf.mxu3 }
  0xdc   :  { %v794_v44 = vadd.f32 %v793_v35, %v196_v42 }
  0xdd   :  { %v877_v33 = vpack.c.bf16 %v875_v29, %v875_v29 }
  0xde   :  { %v806_v34 = vpop.f32.mrf.mxu2  ;;  %v769_v36 = vpop.f32.mrf.mxu1 }
  0xdf   :  { %1019 = vmatmul.bf16.vlgmr.msrb.gmra.mxu1 %v877_v33  ;;  %v807_v46 = vadd.f32 %v806_v34, %v794_v44 }
  0xe3   :  { %v795_v41 = vpop.f32.mrf.mxu3 }
  0xe6   :  { %v808_v40 = vpop.f32.mrf.mxu2 }
  0xf3   :  { %v819_v45 = vpop.f32.mrf.mxu0 }
  0xf4   :  { %v820_v48 = vadd.f32 %v819_v45, %v807_v46 }
  0xf6   :  { %v832_v47 = vpop.f32.mrf.mxu1 }
  0xf7   :  { %v833_v52 = vadd.f32 %v832_v47, %v820_v48 }
  0xfb   :  { %v845_v49 = vpop.f32.mrf.mxu3  ;;  %v821_v50 = vpop.f32.mrf.mxu0 }
  0xfc   :  { %v846_v54 = vadd.f32 %v845_v49, %v833_v52 }
  0xfe   :  { %v858_v53 = vpop.f32.mrf.mxu2  ;;  %v834_v55 = vpop.f32.mrf.mxu1 }
  0xff   :  { %v859_v56 = vadd.f32 %v858_v53, %v846_v54 }
 0x103   :  { %v847_v57 = vpop.f32.mrf.mxu3  ;;  %v871_v59 = vpop.f32.mrf.mxu0 }
 0x104   :  { %v872_v60 = vadd.f32 %v871_v59, %v859_v56 }
 0x106   :  { %v860_v61 = vpop.f32.mrf.mxu2  ;;  %v876_v62 = vmax.f32 %v872_v60, 0.0 }
 0x108   :  { %v878_v63 = vpack.c.bf16 %v876_v62, %v876_v62 }
 0x10a   :  { %1032 = vmatmul.bf16.vlgmr.msrb.gmra.mxu3 %v878_v63 }
 0x10b   :  { %v873_v0 = vpop.f32.mrf.mxu0 }
 0x15c   :  { %v1020_v1 = vpop.f32.mrf.mxu1 }
 0x15d   :  { %v1021_v6 = vadd.f32 %v1660_v5, %v1020_v1 }
 0x164   :  { %v1022_v2 = vpop.f32.mrf.mxu1 }
 0x18d   :  { %v1033_v51 = vpop.f32.mrf.mxu3 }
 0x18e   :  { %v1034_v30 = vadd.f32 %v1033_v51, %v1021_v6 }
 0x190   :  { %1037 = vmax.xlane.f32.xlu0 %v1034_v30 }
 0x195   :  { %v1035_v7 = vpop.f32.mrf.mxu3 }
 0x203   :  { %v1038_v3 = vpop.xlane.xlu0 %1037 }
 0x204   :  { %v1039_v37 = vsub.f32 %v1034_v30, %v1038_v3 }
 0x206   :  { %v1040_v8 = vmul.f32 1.442695, %v1039_v37 }
 0x208   :  { %1661 = vpow2.f32 %v1040_v8 }
 0x20e   :  { %v1662_v43 = vpop.eup %1661 }
 0x20f   :  { %1042 = vadd.xlane.f32.xlu0 %v1662_v43 }
 0x282   :  { %v1043_v9 = vpop.xlane.xlu0 %1042 }
 0x283   :  { %1663 = vrcp.f32 %v1043_v9  ;;  %v1055_v58 = vand.u32 2147483648, %v1043_v9  ;;  %v1053_v13 = vand.u32 2147483647, %v1043_v9  ;;  %vm1049_vm2 = vweird.f32 %v1043_v9 }
 0x285   :  { %v1056_v15 = vor.u32 1.1754944e-38, %v1055_v58  ;;  %vm1054_vm4 = vcmp.eq.f32.partialorder %v1053_v13, 8.507059e+37 }
 0x289   :  { %v1664_v10 = vpop.eup %1663 }
 0x28a   :  { %v1045_v4 = vmul.f32 %v1664_v10, %v1043_v9  ;;  %vm1050_vm1 = vweird.f32 %v1664_v10 }
 0x28b   :  { %vm1051_vm3 = vmor %vm1049_vm2, %vm1050_vm1 }
 0x28c   :  { %v1046_v11 = vsub.f32 1.0, %v1045_v4 }
 0x28e   :  { %v1047_v12 = vmul.f32 %v1664_v10, %v1046_v11 }
 0x290   :  { %v1048_v14 = vadd.f32 %v1664_v10, %v1047_v12 }
 0x292   :  { %v1052_v16 = vsel %vm1051_vm3, %v1664_v10, %v1048_v14 }
 0x293   :  { %v1057_v17 = vsel %vm1054_vm4, %v1056_v15, %v1052_v16 }
 0x294   :  { %v1058_v18 = vmul.f32 %v1662_v43, %v1057_v17 }
 0x296   :  { %1059 = vst [vmem:[#allocation10] sm:$0xff] %v1058_v18 }
 0x297   :  { %1070 = dma.vmem_to_hbm [thread:$0]  %s1066_s15, 128, %s1068_s18, [#allocation4]  }
 0x298   :  { %1791 = dma.done.wait [#allocation4], 128  }
 0x299   :  { %1792 = vsyncadd [#allocation4], 4294967168 }
 0x29a   :  { %1075 = vsyncpa [#allocation3], 1 }
 0x29b   :  { %1076 = vsyncpa [#allocation6], 1 }
 0x29c   :  { %1077 = vsyncpa [#allocation9], 1 }
 0x29d   :  { %1078 = vsyncpa [#allocation4], 1 }

</bundles_post_ra>
